<compile_context>
chip_gen: v6e
topology: v6e:2x2x1
jax: 0.10.0
libtpu: 0.0.40
codegen_flags: <defaults>
</compile_context>

<pallas_src>
import functools
import math

import jax
import jax.numpy as jnp
from jax.experimental import pallas as pl
from jax.experimental.pallas import tpu as pltpu

# ---- small deterministic config (stands in for the pretrained checkpoint) ----
VOCAB = 128
HIDDEN = 32
NUM_HEADS = 2
HEAD_DIM = HIDDEN // NUM_HEADS
INTERMEDIATE = 64
NUM_LAYERS = 2
MAX_POS = 16
TYPE_VOCAB = 2
LN_EPS = 1e-12

# MXU operand dtype (f32 accumulation via preferred_element_type everywhere).
MXU_DTYPE = jnp.bfloat16


def _full_spec(shape):
    """Whole-array block, same block for every grid step."""
    n = len(shape)
    return pl.BlockSpec(shape, lambda *_, _n=n: (0,) * _n)


def _ln_math(x, g, b):
    mu = jnp.mean(x, axis=-1, keepdims=True)
    var = jnp.mean(jnp.square(x - mu), axis=-1, keepdims=True)
    return (x - mu) * jax.lax.rsqrt(var + LN_EPS) * g + b


def _gelu(y):
    # BERT GELU (tanh approximation).
    c = math.sqrt(2.0 / math.pi)
    return 0.5 * y * (1.0 + jnp.tanh(c * (y + 0.044715 * y * y * y)))


def _mm(a, b):
    """MXU matmul with bf16 operands and f32 accumulation."""
    return jnp.dot(a.astype(MXU_DTYPE), b.astype(MXU_DTYPE),
                   preferred_element_type=jnp.float32)


# ---------------------------------------------------------------------------
# Embedding LayerNorm kernel (small; grid over row tiles, "parallel")
# ---------------------------------------------------------------------------
def _ln_kernel(x_ref, g_ref, b_ref, o_ref):
    o_ref[...] = _ln_math(x_ref[...], g_ref[...], b_ref[...])


def layernorm(x, g, b, rows_per_block):
    m, h = x.shape
    return pl.pallas_call(
        _ln_kernel,
        out_shape=jax.ShapeDtypeStruct((m, h), jnp.float32),
        grid=(m // rows_per_block,),
        in_specs=[pl.BlockSpec((rows_per_block, h), lambda i: (i, 0)),
                  _full_spec((1, h)), _full_spec((1, h))],
        out_specs=pl.BlockSpec((rows_per_block, h), lambda i: (i, 0)),
        compiler_params=pltpu.CompilerParams(
            dimension_semantics=("parallel",)),
    )(x, g, b)


# ---------------------------------------------------------------------------
# Fused encoder layer kernel: one grid step = one batch element.
#   QKV -> per-head attention -> output proj -> add+LN -> FFN(GELU) -> add+LN
# ---------------------------------------------------------------------------
def _encoder_layer_kernel(x_ref, mask_ref,
                          qkv_w_ref, qkv_b_ref, o_w_ref, o_b_ref,
                          ln1_g_ref, ln1_b_ref,
                          ff1_w_ref, ff1_b_ref, ff2_w_ref, ff2_b_ref,
                          ln2_g_ref, ln2_b_ref,
                          out_ref, ctx_ref,
                          *, num_heads, head_dim, scale):
    x = x_ref[...]                                   # (S, H) f32
    S, H = x.shape

    # ---- fused QKV projection: one (S,H)x(H,3H) MXU matmul ----
    qkv = _mm(x, qkv_w_ref[...]) + qkv_b_ref[...]    # (S, 3H) f32
    q = qkv[:, 0 * H:1 * H]
    k = qkv[:, 1 * H:2 * H]
    v = qkv[:, 2 * H:3 * H]

    bias = mask_ref[...]                             # (1, S) additive key bias

    # ---- attention, all heads inside this invocation (static unroll) ----
    for h in range(num_heads):
        lo, hi = h * head_dim, (h + 1) * head_dim
        qh, kh, vh = q[:, lo:hi], k[:, lo:hi], v[:, lo:hi]
        scores = jax.lax.dot_general(
            qh, kh, (((1,), (1,)), ((), ())),
            preferred_element_type=jnp.float32) * scale + bias
        mmax = jnp.max(scores, axis=-1, keepdims=True)
        e = jnp.exp(scores - mmax)
        denom = jnp.sum(e, axis=-1, keepdims=True)
        probs = e * pl.reciprocal(denom, approx=True)   # EUP slot, VALU-free
        ctx_ref[:, lo:hi] = jnp.dot(probs, vh,
                                    preferred_element_type=jnp.float32)

    ctx = ctx_ref[...]                               # (S, H)

    # ---- output projection + residual + LayerNorm ----
    attn = _mm(ctx, o_w_ref[...]) + o_b_ref[...]
    x1 = _ln_math(attn + x, ln1_g_ref[...], ln1_b_ref[...])

    # ---- FFN (GELU) + residual + LayerNorm ----
    ffn = _gelu(_mm(x1, ff1_w_ref[...]) + ff1_b_ref[...])
    ffn2 = _mm(ffn, ff2_w_ref[...]) + ff2_b_ref[...]
    out_ref[...] = _ln_math(ffn2 + x1, ln2_g_ref[...], ln2_b_ref[...])


def encoder_layer(x, p, mask_bias3, B, S):
    m, H = x.shape
    I = p["ff1_w"].shape[1]
    return pl.pallas_call(
        functools.partial(_encoder_layer_kernel,
                          num_heads=NUM_HEADS, head_dim=HEAD_DIM,
                          scale=1.0 / math.sqrt(HEAD_DIM)),
        out_shape=jax.ShapeDtypeStruct((m, H), jnp.float32),
        grid=(B,),
        in_specs=[
            pl.BlockSpec((S, H), lambda b: (b, 0)),               # x rows of batch b
            pl.BlockSpec((None, 1, S), lambda b: (b, 0, 0)),      # mask row, squeezed
            _full_spec((H, 3 * H)), _full_spec((1, 3 * H)),       # fused QKV
            _full_spec((H, H)), _full_spec((1, H)),               # output proj
            _full_spec((1, H)), _full_spec((1, H)),               # LN1
            _full_spec((H, I)), _full_spec((1, I)),               # FFN in
            _full_spec((I, H)), _full_spec((1, H)),               # FFN out
            _full_spec((1, H)), _full_spec((1, H)),               # LN2
        ],
        out_specs=pl.BlockSpec((S, H), lambda b: (b, 0)),
        scratch_shapes=[pltpu.VMEM((S, H), jnp.float32)],         # merged heads
        compiler_params=pltpu.CompilerParams(
            dimension_semantics=("parallel",)),
    )(x, mask_bias3,
      p["qkv_w"], p["qkv_b"], p["o_w"], p["o_b"],
      p["ln1_g"], p["ln1_b"],
      p["ff1_w"], p["ff1_b"], p["ff2_w"], p["ff2_b"],
      p["ln2_g"], p["ln2_b"])


# ---------------------------------------------------------------------------
# Fused MLM head kernel: dense+GELU -> LayerNorm -> tied decoder matmul + bias
# ---------------------------------------------------------------------------
def _mlm_head_kernel(x_ref, dw_ref, db_ref, g_ref, b_ref, we_ref, decb_ref,
                     o_ref):
    h = _gelu(_mm(x_ref[...], dw_ref[...]) + db_ref[...])
    h = _ln_math(h, g_ref[...], b_ref[...])
    # Decoder tied to word embeddings: contract hidden axis of word_emb
    # directly (no transposed copy of the embedding table in HBM).
    logits = jax.lax.dot_general(
        h.astype(MXU_DTYPE), we_ref[...].astype(MXU_DTYPE),
        (((1,), (1,)), ((), ())),
        preferred_element_type=jnp.float32) + decb_ref[...]
    o_ref[...] = logits


def mlm_head(x, params, rows_per_block):
    m, H = x.shape
    V = params["word_emb"].shape[0]
    return pl.pallas_call(
        _mlm_head_kernel,
        out_shape=jax.ShapeDtypeStruct((m, V), jnp.float32),
        grid=(m // rows_per_block,),
        in_specs=[pl.BlockSpec((rows_per_block, H), lambda i: (i, 0)),
                  _full_spec((H, H)), _full_spec((1, H)),
                  _full_spec((1, H)), _full_spec((1, H)),
                  _full_spec((V, H)), _full_spec((1, V))],
        out_specs=pl.BlockSpec((rows_per_block, V), lambda i: (i, 0)),
        compiler_params=pltpu.CompilerParams(
            dimension_semantics=("parallel",)),
    )(x, params["mlm_dense_w"], params["mlm_dense_b"],
      params["mlm_ln_g"], params["mlm_ln_b"],
      params["word_emb"], params["decoder_b"])


# ---------------------------------------------------------------------------
# Model glue (plain JAX): embedding gathers, mask bias, layer stack
# ---------------------------------------------------------------------------
def bert_mlm_forward(params, input_ids, attention_mask, token_type_ids):
    B, S = input_ids.shape
    pos_ids = jnp.arange(S)
    # TODO(synk): embedding gather stays in plain JAX (data-dependent gather).
    emb = (params["word_emb"][input_ids]
           + params["pos_emb"][pos_ids][None, :, :]
           + params["type_emb"][token_type_ids])
    x = emb.reshape(B * S, HIDDEN)
    x = layernorm(x, params["emb_ln_g"], params["emb_ln_b"], rows_per_block=S)

    # HF-style extended attention mask: 0 -> -10000, 1 -> 0, added to scores.
    mask_bias3 = ((1.0 - attention_mask.astype(jnp.float32))
                  * -10000.0)[:, None, :]                     # (B, 1, S)

    for lp in params["layers"]:
        x = encoder_layer(x, lp, mask_bias3, B, S)

    logits = mlm_head(x, params, rows_per_block=S)
    return logits.reshape(B, S, VOCAB)


def init_params(key):
    ks = list(jax.random.split(key, 32))
    it = iter(ks)

    def W(shape):
        return 0.02 * jax.random.normal(next(it), shape, dtype=jnp.float32)

    def ones(shape):
        return jnp.ones(shape, jnp.float32)

    def zeros(shape):
        return jnp.zeros(shape, jnp.float32)

    params = {
        "word_emb": W((VOCAB, HIDDEN)),
        "pos_emb": W((MAX_POS, HIDDEN)),
        "type_emb": W((TYPE_VOCAB, HIDDEN)),
        "emb_ln_g": ones((1, HIDDEN)), "emb_ln_b": zeros((1, HIDDEN)),
        "layers": [],
        "mlm_dense_w": W((HIDDEN, HIDDEN)), "mlm_dense_b": zeros((1, HIDDEN)),
        "mlm_ln_g": ones((1, HIDDEN)), "mlm_ln_b": zeros((1, HIDDEN)),
        "decoder_b": zeros((1, VOCAB)),
    }
    for _ in range(NUM_LAYERS):
        params["layers"].append({
            # Q/K/V weights stored pre-concatenated: one [H, 3H] matmul.
            "qkv_w": W((HIDDEN, 3 * HIDDEN)), "qkv_b": zeros((1, 3 * HIDDEN)),
            "o_w": W((HIDDEN, HIDDEN)), "o_b": zeros((1, HIDDEN)),
            "ln1_g": ones((1, HIDDEN)), "ln1_b": zeros((1, HIDDEN)),
            "ff1_w": W((HIDDEN, INTERMEDIATE)), "ff1_b": zeros((1, INTERMEDIATE)),
            "ff2_w": W((INTERMEDIATE, HIDDEN)), "ff2_b": zeros((1, HIDDEN)),
            "ln2_g": ones((1, HIDDEN)), "ln2_b": zeros((1, HIDDEN)),
        })
    return params


if __name__ == "__main__":
    key = jax.random.PRNGKey(0)
    pkey, dkey = jax.random.split(key)
    params = init_params(pkey)

    B, S = 2, 8
    k1, k2 = jax.random.split(dkey)
    input_ids = jax.random.randint(k1, (B, S), 0, VOCAB, dtype=jnp.int32)
    token_type_ids = jax.random.randint(k2, (B, S), 0, TYPE_VOCAB, dtype=jnp.int32)
    attention_mask = jnp.array(
        [[1, 1, 1, 1, 1, 1, 1, 1],
         [1, 1, 1, 1, 1, 1, 0, 0]], dtype=jnp.int32)

    logits = bert_mlm_forward(params, input_ids, attention_mask, token_type_ids)
    logits = jax.block_until_ready(logits)
    assert logits.shape == (B, S, VOCAB)
    assert logits.dtype == jnp.float32
    assert bool(jnp.all(jnp.isfinite(logits)))
    print("KERNEL_OK")
</pallas_src>

<mosaic_0001>
module attributes {stable_mosaic.version = 11 : i64} {
  func.func @_ln_kernel(%arg0: i32, %arg1: memref<8x32xf32, #tpu.memory_space<vmem>>, %arg2: memref<1x32xf32, #tpu.memory_space<vmem>>, %arg3: memref<1x32xf32, #tpu.memory_space<vmem>>, %arg4: memref<8x32xf32, #tpu.memory_space<vmem>>) attributes {dimension_semantics = [#tpu.dimension_semantics<parallel>], iteration_bounds = array<i64: 2>, scalar_prefetch = 0 : i64, scratch_operands = 0 : i64, tpu.core_type = #tpu.core_type<tc>, window_params = [{transform_indices = @transform_0, window_bounds = array<i64: 8, 32>}, {pipeline_mode = #tpu.pipeline_mode<synchronous>, transform_indices = @transform_1, window_bounds = array<i64: 1, 32>}, {pipeline_mode = #tpu.pipeline_mode<synchronous>, transform_indices = @transform_2, window_bounds = array<i64: 1, 32>}, {transform_indices = @transform_3, window_bounds = array<i64: 8, 32>}]} {
    %c0 = arith.constant 0 : index
    %c0_0 = arith.constant 0 : index
    %0 = vector.load %arg1[%c0, %c0_0] : memref<8x32xf32, #tpu.memory_space<vmem>>, vector<8x32xf32>
    %c0_1 = arith.constant 0 : index
    %c0_2 = arith.constant 0 : index
    %1 = vector.load %arg2[%c0_1, %c0_2] : memref<1x32xf32, #tpu.memory_space<vmem>>, vector<1x32xf32>
    %c0_3 = arith.constant 0 : index
    %c0_4 = arith.constant 0 : index
    %2 = vector.load %arg3[%c0_3, %c0_4] : memref<1x32xf32, #tpu.memory_space<vmem>>, vector<1x32xf32>
    %cst = arith.constant dense<0.000000e+00> : vector<8xf32>
    %3 = vector.multi_reduction <add>, %0, %cst [1] : vector<8x32xf32> to vector<8xf32>
    %4 = vector.shape_cast %3 : vector<8xf32> to vector<8x1xf32>
    %cst_5 = arith.constant 3.200000e+01 : f32
    %5 = vector.broadcast %cst_5 : f32 to vector<8x1xf32>
    %6 = arith.divf %4, %5 : vector<8x1xf32>
    %7 = vector.broadcast %6 : vector<8x1xf32> to vector<8x32xf32>
    %8 = arith.subf %0, %7 : vector<8x32xf32>
    %9 = arith.mulf %8, %8 : vector<8x32xf32>
    %cst_6 = arith.constant dense<0.000000e+00> : vector<8xf32>
    %10 = vector.multi_reduction <add>, %9, %cst_6 [1] : vector<8x32xf32> to vector<8xf32>
    %11 = vector.shape_cast %10 : vector<8xf32> to vector<8x1xf32>
    %cst_7 = arith.constant 3.200000e+01 : f32
    %12 = vector.broadcast %cst_7 : f32 to vector<8x1xf32>
    %13 = arith.divf %11, %12 : vector<8x1xf32>
    %14 = vector.broadcast %6 : vector<8x1xf32> to vector<8x32xf32>
    %15 = arith.subf %0, %14 : vector<8x32xf32>
    %cst_8 = arith.constant 9.99999996E-13 : f32
    %16 = vector.broadcast %cst_8 : f32 to vector<8x1xf32>
    %17 = arith.addf %13, %16 : vector<8x1xf32>
    %18 = math.rsqrt %17 : vector<8x1xf32>
    %19 = vector.broadcast %18 : vector<8x1xf32> to vector<8x32xf32>
    %20 = arith.mulf %15, %19 : vector<8x32xf32>
    %21 = vector.broadcast %1 : vector<1x32xf32> to vector<8x32xf32>
    %22 = arith.mulf %20, %21 : vector<8x32xf32>
    %23 = vector.broadcast %2 : vector<1x32xf32> to vector<8x32xf32>
    %24 = arith.addf %22, %23 : vector<8x32xf32>
    %c0_9 = arith.constant 0 : index
    %c0_10 = arith.constant 0 : index
    %25 = vector.load %arg4[%c0_9, %c0_10] : memref<8x32xf32, #tpu.memory_space<vmem>>, vector<8x32xf32>
    tpu.vector_store %arg4[%c0_9, %c0_10], %24 {strides = array<i32>} : memref<8x32xf32, #tpu.memory_space<vmem>>, vector<8x32xf32>,
    return
  }
  func.func @transform_0(%arg0: i32) -> (i32, i32) {
    %c0_i32 = arith.constant 0 : i32
    %c0_i32_0 = arith.constant 0 : i32
    return %arg0, %c0_i32 : i32, i32
  }
  func.func @transform_1(%arg0: i32) -> (i32, i32) {
    %c0_i32 = arith.constant 0 : i32
    %c0_i32_0 = arith.constant 0 : i32
    %c0_i32_1 = arith.constant 0 : i32
    return %c0_i32, %c0_i32_0 : i32, i32
  }
  func.func @transform_2(%arg0: i32) -> (i32, i32) {
    %c0_i32 = arith.constant 0 : i32
    %c0_i32_0 = arith.constant 0 : i32
    %c0_i32_1 = arith.constant 0 : i32
    return %c0_i32, %c0_i32_0 : i32, i32
  }
  func.func @transform_3(%arg0: i32) -> (i32, i32) {
    %c0_i32 = arith.constant 0 : i32
    %c0_i32_0 = arith.constant 0 : i32
    return %arg0, %c0_i32 : i32, i32
  }
}

</mosaic_0001>

<bundles_post_ra>
// kernel: tpu_custom_call.1
= control target key start
LH: loop header
LB: loop body
LE: loop exit
PB: predicated region body
PF: predicated region fallthrough
CT: control target
= control target key end

     0   :  { %8 = vsyncpa [#allocation3], 0  ;;  %s631_s0 = inlined_call_operand.hbm [shape: f32[16,32], index: 0, kind: input, shape index: {}]   ;;  %s632_s1 = inlined_call_operand.vmem [shape: f32[1,32], index: 1, kind: input, shape index: {}]   ;;  %s633_s2 = inlined_call_operand.vmem [shape: f32[1,32], index: 2, kind: input, shape index: {}]   ;;  %s634_s3 = inlined_call_operand.hbm [shape: f32[16,32], index: 3, kind: output, shape index: {}]  }
   0x1   :  { %10 = vsyncpa [#allocation3 + $0x1], 0 }
   0x2   :  { %11 = vsyncpa [#allocation4], 0 }
   0x3   :  { %13 = vsyncpa [#allocation4 + $0x1], 0  ;;  %s481_s12 = smov 0   ;;  %s483_s13 = smov 0  }
   0x4   :  { %s485_s14 = smov 0   ;;  %s487_s15 = smov 0  }
   0x5 LB: > { %s502_s16 = sadd.s32 4294967295, %s457_s15   ;;  %s303_s17 = sadd.s32 4294967294, %s457_s15   ;;  %s457_s15 = sphi %s487_s15, %s651_s15   ;;  %s453_s14 = sphi %s485_s14, %s650_s14   ;;  %s449_s13 = sphi %s483_s13, %s649_s13   ;;  %s445_s12 = sphi %s481_s12, %s648_s12  }
   0x6   : > { %s506_s18 = sadd.s32 1, %s457_s15   ;;  %s26_s19 = sadd.s32 1, %s453_s14 }
   0x7   : > { %s23_s20 = ssub.s32 %s457_s15, %s506_s18  ;;  %p33_p0 = scmp.ne.s32.totalorder %s453_s14, %s449_s13 }
   0x8   : > { %p24_p1 = scmp.eq.s32.totalorder %s23_s20, 0  ;;  %p34_p2 = scmp.eq.s32.totalorder %s457_s15, 0 }
   0x9   : > { %p39_p3 = scmp.ne.s32.totalorder %s449_s13, %s445_s12  ;;  %p40_p4 = scmp.eq.s32.totalorder %s502_s16, 0 }
   0xa   : > { %s518_s21 = scalar_select %p24_p1, %s453_s14, %s26_s19  }
   0xb   : > { %p520_p5 = por %p34_p2, %p33_p0  ;;  %p524_p6 = por %p40_p4, %p39_p3 }
   0xc   : > { %p105_p7 = scmp.eq.s32.totalorder %s502_s16, 1  ;;  %p111_p8 = scmp.eq.s32.totalorder %s303_s17, 1 }
   0xd   : > { %s638_s23 = scalar_select %p524_p6, 1, 0 }
   0xe   : > { %p329_p10 = scmp.lt.s32.totalorder %s457_s15, 2  ;;  %p531_p11 = por %p105_p7, %p33_p0 }
   0xf   : > { %p535_p12 = por %p111_p8, %p39_p3  ;;  %s137_s26 = sand.u32 1, %s453_s14  }
  0x10   : > { %s639_s24 = scalar_select %p531_p11, 1, 0 }
  0x11   : > { %s640_s25 = scalar_select %p535_p12, 1, 0 }
  0x12   : > { %s307_s27 = sshll.u32 %s457_s15, 7  ;;  %s306_s28 = sshll.u32 %s137_s26, 3 }
  0x13   : > { %s544_s4 = scalar_lea.hbm %s631_s0, %s307_s27  ;;  %s141_s5 = scalar_lea.vmem [#allocation2], %s306_s28 }
  0x14   : > { %s148_s6 = sshll.u32 %s141_s5, 4  ;;  %p548_p13 = pnand %p329_p10, %p520_p5  ;;  %s552_s6 = int_to_ptr.vmem [resolvable:$true] %s148_s6 }
  0x15   : > { %s138_s8 = scalar_lea.sflag [#allocation3], %s137_s26  ;;  %s365_s9 = scalar_lea.hbm %s544_s4, 128 }
  0x16   : > { %p366_p2 = scmp.ne.s32.totalorder %s544_s4, %s365_s9  ;;  %p367_p3 = pneg %p548_p13 }
  0x17   : > { %s370_s17 = scalar_lea.hbm %s631_s0, 256  ;;  %p371_p5 = scmp.lt.s32.totalorder %s544_s4, %s631_s0 }
  0x18   : > { %p368_p4 = pnand %p367_p3, %p366_p2  ;;  %p372_p8 = scmp.lt.s32.totalorder %s370_s17, %s365_s9 }
  0x1a   : > { %p369_p7 = pneg %p368_p4  ;;  %p373_p10 = por %p372_p8, %p371_p5 }
  0x1c   : > { %p374_p9 = pnand %p373_p10, %p369_p7 }
  0x1e   : > { %377 = shalt.err (!%p374_p9)
}
  0x1f   : > { %s378_s22 = scalar_lea.vmem %s552_s6, 128  ;;  %s459_s26 = smov [#allocation2]  }
  0x20   : > { %p379_p0 = scmp.ne.s32.totalorder %s552_s6, %s378_s22  ;;  %s383_s27 = sshll.u32 %s459_s26, 4  ;;  %s384_s27 = int_to_ptr.vmem [resolvable:$false] %s383_s27 }
  0x21   : > { %s385_s28 = scalar_lea.vmem %s384_s27, 256  ;;  %p386_p4 = scmp.lt.s32.totalorder %s552_s6, %s384_s27 }
  0x22   : > { %p381_p1 = pnand %p379_p0, %p367_p3  ;;  %p387_p12 = scmp.lt.s32.totalorder %s385_s28, %s378_s22 }
  0x24   : > { %p382_p2 = pneg %p381_p1  ;;  %p388_p11 = por %p387_p12, %p386_p4 }
  0x26   : > { %p389_p6 = pnand %p388_p11, %p382_p2 }
  0x28   : > { %392 = shalt.err (!%p389_p6)
}
  0x29   : > { %324 = dma.hbm_to_vmem [thread:$0]  (!%p548_p13), %s544_s4, 128, %s552_s6, %s138_s8  }
  0x2a   : > { %p642_p9 = scmp.lt.s32.totalorder %s457_s15, 3  ;;  %p643_p7 = scmp.ge.s32.totalorder %s457_s15, 1 }
  0x2c   : > { %p154_p0 = pnand %p643_p7, %p642_p9 }
  0x2d   : > { %s579_s29 = sand.u32 (!%p154_p0), 1, %s449_s13   ;;  %p644_p6 = scmp.ne.s32.totalorder (!%p154_p0), %s638_s23, 0 }
  0x2e   : > { %157 = sbr.rel (%p154_p0) target bundleno = 374 (0x176), region = 32  ;;  %s309_s30 = sshll.u32 (!%p154_p0), %s579_s29, 3 }
  0x2f   : > { %s160_s5 = scalar_lea.sflag (!%p154_p0), [#allocation3], %s579_s29  ;;  %s163_s9 = scalar_lea.vmem (!%p154_p0), [#allocation2], %s309_s30 }
  0x33   : > { %436 = dma.done.wait (%p644_p6), %s160_s5, 128  }
  0x34   : > { %438 = vsyncadd (%p644_p6), %s160_s5, 4294967168  ;;  %vm189_vm0 = vcmask 261120   ;;  %v186_v0 = vld [vmem:[%s163_s9] sm:$0xff]  ;;  %s314_s8 = sshll.u32 %s502_s16, 7  ;;  %s185_s10 = scalar_lea.vmem [#allocation5], %s309_s30 }
  0x35   : > { %v190_v1 = vsel %vm189_vm0, %v186_v0, 0.0  ;;  %v311_v11 = vld [vmem:[%s632_s1] ss:$0 sm:$0xff]  ;;  %s233_s11 = sshll.u32 %s185_s10, 4  ;;  %s231_s20 = scalar_lea.hbm %s634_s3, %s314_s8  ;;  %s234_s11 = int_to_ptr.vmem [resolvable:$true] %s233_s11 }
  0x36   : > { %191 = vadd.xlane.f32.xlu0 %v190_v1  ;;  %v312_v13 = vld [vmem:[%s633_s2] ss:$0 sm:$0xff]  ;;  %s220_s22 = scalar_lea.sflag [#allocation4], %s579_s29  ;;  %s393_s26 = scalar_lea.vmem %s234_s11, 128 }
  0x37   : > { %p394_p11 = scmp.ne.s32.totalorder %s234_s11, %s393_s26  ;;  %p645_p12 = scmp.ne.s32.totalorder %s639_s24, 0 }
  0x38   : > { %s460_s27 = smov [#allocation5]  }
  0x39   : > { %p395_p13 = pnand %p394_p11, %p645_p12  ;;  %s397_s28 = sshll.u32 %s460_s27, 4  ;;  %s398_s28 = int_to_ptr.vmem [resolvable:$false] %s397_s28 }
  0x3a   : > { %s399_s16 = scalar_lea.vmem %s398_s28, 256  ;;  %p400_p3 = scmp.lt.s32.totalorder %s234_s11, %s398_s28 }
  0x3b   : > { %p396_p1 = pneg %p395_p13  ;;  %p401_p5 = scmp.lt.s32.totalorder %s399_s16, %s393_s26 }
  0x3d   : > { %p402_p8 = por %p401_p5, %p400_p3 }
  0x3f   : > { %p403_p10 = pnand %p402_p8, %p396_p1 }
  0xbf   : > { %v192_v2 = vpop.xlane.xlu0 %191 }
  0xc0   : > { %v194_v3 = vmul.f32 0.03125, %v192_v2 }
  0xc2   : > { %v195_v4 = vsub.f32 %v186_v0, %v194_v3 }
  0xc4   : > { %v196_v5 = vmul.f32 %v195_v4, %v195_v4 }
  0xc6   : > { %v197_v6 = vsel %vm189_vm0, %v196_v5, 0.0 }
  0xc7   : > { %198 = vadd.xlane.f32.xlu0 %v197_v6 }
 0x150   : > { %v199_v7 = vpop.xlane.xlu0 %198 }
 0x151   : > { %v200_v8 = vmul.f32 0.03125, %v199_v7 }
 0x153   : > { %v201_v9 = vadd.f32 1e-12, %v200_v8 }
 0x155   : > { %363 = vrsqrt.f32 %v201_v9 }
 0x162   : > { %v364_v10 = vpop.eup %363 }
 0x163   : > { %v203_v12 = vmul.f32 %v364_v10, %v195_v4 }
 0x165   : > { %v210_v14 = vmul.f32 %v311_v11, %v203_v12 }
 0x167   : > { %v217_v15 = vadd.f32 %v312_v13, %v210_v14 }
 0x169   : > { %218 = vst.msk [vmem:[%s185_s10] sm:$0xff] %vm189_vm0, %v217_v15 }
 0x16a   : > { %406 = shalt.err (!%p403_p10)
}
 0x16b   : > { %s407_s30 = scalar_lea.hbm %s231_s20, 128  ;;  %s411_s9 = scalar_lea.hbm %s634_s3, 256 }
 0x16c   : > { %p408_p2 = scmp.ne.s32.totalorder %s231_s20, %s407_s30  ;;  %p412_p7 = scmp.lt.s32.totalorder %s231_s20, %s634_s3 }
 0x16d   : > { %p413_p0 = scmp.lt.s32.totalorder %s411_s9, %s407_s30 }
 0x16e   : > { %p409_p4 = pnand %p408_p2, %p645_p12 }
 0x16f   : > { %p414_p6 = por %p413_p0, %p412_p7 }
 0x170   : > { %p410_p9 = pneg %p409_p4 }
 0x172   : > { %p415_p11 = pnand %p414_p6, %p410_p9 }
 0x174   : > { %418 = shalt.err (!%p415_p11)
}
 0x175   : > { %319 = dma.vmem_to_hbm [thread:$0]  (%p645_p12), %s234_s11, 128, %s231_s20, %s220_s22  }
 0x176 PF: > { %s245_s6 = sand.u32 1, %s445_s12   ;;  %p646_p13 = scmp.ne.s32.totalorder %s640_s25, 0 }
 0x177   : > { %p647_p1 = scmp.ge.s32.totalorder %s457_s15, 2  ;;  %s246_s7 = scalar_lea.sflag [#allocation4], %s245_s6 }
 0x179   : > { %p326_p3 = pnand %p647_p1, %p646_p13 }
 0x17b   : > { %p327_p5 = pneg %p326_p3 }
 0x17d   : > { %440 = dma.done.wait (%p327_p5), %s246_s7, 128  }
 0x17e   : > { %442 = vsyncadd (%p327_p5), %s246_s7, 4294967168  ;;  %p16_p8 = scmp.ge.s32.totalorder %s506_s18, 4   ;;  %s648_s12 = smov %s449_s13 }
 0x17f   : > { %s649_s13 = smov %s453_s14  ;;  %s650_s14 = smov %s518_s21 }
 0x180   : > { %s651_s15 = smov %s506_s18  ;;  %18 = sbr.rel (!%p16_p8) target bundleno = 5 (0x5), region = 77 }
 0x185   :  { %251 = vsyncpa [#allocation3], 1 }
 0x186   :  { %253 = vsyncpa [#allocation3 + $0x1], 1 }
 0x187   :  { %254 = vsyncpa [#allocation4], 1 }
 0x188   :  { %256 = vsyncpa [#allocation4 + $0x1], 1 }

</bundles_post_ra>
